<compile_context>
chip_gen: v6e
topology: v6e:2x2x1
jax: 0.10.0
libtpu: 0.0.40
codegen_flags: <defaults>
</compile_context>

<pallas_src>
import functools

import jax
import jax.numpy as jnp
import numpy as np
from jax.experimental import pallas as pl
from jax.experimental.pallas import tpu as pltpu

_SUB = 8        # f32 sublanes per vreg
_LANE = 128     # lanes
_FUSED_F32_BYTES = 2 * 1024 * 1024   # fused path: f32 working-array budget
_VMEM_LIMIT = 32 * 1024 * 1024       # safe on all gens (v5e scoped default=16)


def _round_up(a, b):
    return (a + b - 1) // b * b


def _default_block_rows():
    """Tile height tuned per generation (128 MiB VMEM -> bigger tiles)."""
    try:
        kind = jax.devices()[0].device_kind.lower()
    except Exception:
        return 2048
    if "v5" in kind or "v6" in kind:
        return 4096          # 2 MiB f32 blocks; plenty of headroom
    return 2048              # v7x (64 MiB VMEM) / unknown: stay conservative


# ----------------------------------------------------------------------------
# Fused kernel: whole tensor resident in VMEM (small / medium weights)
# ----------------------------------------------------------------------------
def _fused_kernel(x_ref, o_ref, *, scale):
    x = x_ref[...].astype(jnp.float32)
    # max|tanh(x)| == tanh(max|x|): a single scalar tanh instead of a second
    # full elementwise pass.
    m = jnp.max(jnp.abs(x))
    a = (0.5 * scale) / jnp.tanh(m)
    t = jnp.tanh(x)
    o_ref[...] = (jnp.round(t * a + 0.5 * scale) * (2.0 / scale)
                  - 1.0).astype(o_ref.dtype)


# ----------------------------------------------------------------------------
# Kernel 1 (two-pass path): per-tile partial max of |x|
# ----------------------------------------------------------------------------
def _absmax_kernel(x_ref, pmax_ref, *, tile_rows, valid_rows):
    ax = jnp.abs(x_ref[...].astype(jnp.float32))
    if valid_rows is not None:
        # Ragged final block: rows past the logical array hold stale data;
        # mask them so they cannot inflate the global max.
        row = (pl.program_id(0) * tile_rows
               + jax.lax.broadcasted_iota(jnp.int32, ax.shape, 0))
        ax = jnp.where(row < valid_rows, ax, 0.0)
    # (tr,128) -> (tr//8, 8, 128) and reduce the leading axis: pure VPU
    # pairwise maxes between vregs, no XLU cross-sublane reduce / relayout.
    pmax_ref[...] = jnp.max(ax.reshape(tile_rows // _SUB, _SUB, _LANE), axis=0)


# ----------------------------------------------------------------------------
# Kernel 2 (two-pass path): elementwise quantization, scalar `a` via SMEM
# ----------------------------------------------------------------------------
def _dorefa_kernel(a_ref, x_ref, o_ref, *, scale):
    t = jnp.tanh(x_ref[...].astype(jnp.float32))
    a = a_ref[0]                 # 0.5*scale / max|tanh(x)|, precomputed
    o_ref[...] = (jnp.round(t * a + 0.5 * scale) * (2.0 / scale)
                  - 1.0).astype(o_ref.dtype)


# ----------------------------------------------------------------------------
# Wrapper (WQ.forward)
# ----------------------------------------------------------------------------
def wq_forward(x, wbit, *, block_rows=None,
               fused_max_f32_bytes=_FUSED_F32_BYTES):
    orig_shape = x.shape
    orig_dtype = x.dtype
    scale = float(2 ** wbit - 1)
    itemsize = jnp.dtype(orig_dtype).itemsize

    flat = x.reshape(-1)
    n = flat.shape[0]

    rows = pl.cdiv(n, _LANE)
    lane_pad = rows * _LANE - n
    padded = lane_pad != 0
    if padded:
        # Minimal (lane-granularity) pad only when unaligned; |0| never
        # raises the global max so semantics are preserved.
        flat = jnp.pad(flat, (0, lane_pad))
    x2 = flat.reshape(rows, _LANE)           # native dtype through DMA

    # ---------------- fused fast path -------------------------------------
    if n * 4 <= fused_max_f32_bytes:
        out2 = pl.pallas_call(
            functools.partial(_fused_kernel, scale=scale),
            out_shape=jax.ShapeDtypeStruct((rows, _LANE), orig_dtype),
            compiler_params=pltpu.CompilerParams(
                vmem_limit_bytes=_VMEM_LIMIT),
            cost_estimate=pl.CostEstimate(
                flops=int(8 * n), transcendentals=int(n + 1),
                bytes_accessed=int(2 * n * itemsize)),
        )(x2)
        out_flat = out2.reshape(-1)
        if padded:
            out_flat = out_flat[:n]
        return out_flat.reshape(orig_shape)

    # ---------------- two-pass path (large tensors) ------------------------
    if block_rows is None:
        block_rows = _default_block_rows()

    # sub-32-bit dtypes pack along sublanes -> bump row alignment (8/16/32)
    sub = _SUB * max(1, 4 // max(1, itemsize))

    # Tile height: big enough to amortize per-step overhead, small enough to
    # always give ~>=8 grid steps (v7x megacore split + DMA/compute overlap).
    tr = min(_round_up(block_rows, sub), _round_up(pl.cdiv(rows, 8), sub))
    tr = max(tr, sub)
    num_blocks = pl.cdiv(rows, tr)
    grid = (num_blocks,)
    ragged = (rows % tr) != 0

    # --- pass 1: per-tile partial max of |x| (parallel across tiles / TCs) ---
    pmax = pl.pallas_call(
        functools.partial(_absmax_kernel, tile_rows=tr,
                          valid_rows=rows if ragged else None),
        out_shape=jax.ShapeDtypeStruct((_SUB * num_blocks, _LANE), jnp.float32),
        grid=grid,
        in_specs=[pl.BlockSpec((tr, _LANE), lambda i: (i, 0))],
        out_specs=pl.BlockSpec((_SUB, _LANE), lambda i: (i, 0)),
        compiler_params=pltpu.CompilerParams(
            dimension_semantics=("parallel",),
            vmem_limit_bytes=_VMEM_LIMIT),
        cost_estimate=pl.CostEstimate(
            flops=int(2 * n), transcendentals=0,
            bytes_accessed=int(n * itemsize + _SUB * num_blocks * _LANE * 4)),
    )(x2)

    # Tiny final reduction + scalar tanh (max|tanh(x)| == tanh(max|x|)); the
    # per-step scalar divide is hoisted here as well.
    a = (0.5 * scale) / jnp.tanh(jnp.max(pmax))
    a = a.reshape(1).astype(jnp.float32)

    # --- pass 2: elementwise quantization (scalar `a` delivered via SMEM) ---
    out2 = pl.pallas_call(
        functools.partial(_dorefa_kernel, scale=scale),
        out_shape=jax.ShapeDtypeStruct((rows, _LANE), orig_dtype),
        grid=grid,
        in_specs=[
            pl.BlockSpec(memory_space=pltpu.MemorySpace.SMEM),   # scalar a
            pl.BlockSpec((tr, _LANE), lambda i: (i, 0)),         # x tile
        ],
        out_specs=pl.BlockSpec((tr, _LANE), lambda i: (i, 0)),
        compiler_params=pltpu.CompilerParams(
            dimension_semantics=("parallel",),
            vmem_limit_bytes=_VMEM_LIMIT),
        cost_estimate=pl.CostEstimate(
            flops=int(5 * n), transcendentals=int(n),
            bytes_accessed=int(2 * n * itemsize)),
    )(a, x2)

    out_flat = out2.reshape(-1)
    if padded:
        out_flat = out_flat[:n]
    return out_flat.reshape(orig_shape)


# Pure-JAX reference (mirrors the PyTorch dorefa_quant exactly)
def _dorefa_ref(x, wbit):
    t = jnp.tanh(x)
    scale = 2 ** wbit - 1
    xn = t / 2 / jnp.max(jnp.abs(t)) + 0.5
    xq = jnp.round(xn * scale) / scale
    return 2 * xq - 1


def _check(out, x, wbit, name):
    """Quantizer-aware comparison.

    Outputs are discrete levels; the only legitimate difference vs. the
    reference is a rare single-step flip when round() sits exactly on a
    half-integer boundary and FP evaluation order / tanh implementation
    (in-kernel EUP vs. XLA) differ by an ulp.  Require every element to be
    within one quantization step and allow only a vanishing fraction of
    such boundary flips.
    """
    ref = np.asarray(_dorefa_ref(x, wbit))
    out = np.asarray(out)
    step = 2.0 / (2 ** wbit - 1)
    diff = np.abs(out - ref)
    assert out.shape == x.shape and out.dtype == x.dtype, name
    assert np.all(diff <= step + 1e-5), f"{name}: error beyond one quant step"
    n_flip = int(np.sum(diff > 1e-5))
    assert n_flip <= max(3, out.size // 10000), \
        f"{name}: too many mismatches ({n_flip}/{out.size})"


# TODO(synk): RoundQ.backward (straight-through estimator, grad passthrough)
# is training-only autograd plumbing; only the forward pass is implemented.

if __name__ == "__main__":
    wbit = 4
    k0, k1, k2 = jax.random.split(jax.random.PRNGKey(0), 3)

    # 1) conv-weight-like tensor, lane-aligned -> fused single-kernel path
    x1 = jax.random.normal(k0, (2, 4, 16, 16), dtype=jnp.float32)
    o1 = jax.block_until_ready(wq_forward(x1, wbit))
    _check(o1, x1, wbit, "fused/aligned")

    # 2) unaligned element count -> fused path with minimal lane padding
    x2 = jax.random.normal(k1, (33, 100), dtype=jnp.float32)
    o2 = jax.block_until_ready(wq_forward(x2, wbit))
    _check(o2, x2, wbit, "fused/unaligned")

    # 3) force the tiled two-pass path (ragged last block + lane pad + mask)
    x3 = jax.random.normal(k2, (255, 387), dtype=jnp.float32)
    o3 = jax.block_until_ready(wq_forward(x3, wbit, fused_max_f32_bytes=0))
    _check(o3, x3, wbit, "two-pass/ragged")

    print("KERNEL_OK")
</pallas_src>

<mosaic_0001>
module attributes {stable_mosaic.version = 11 : i64} {
  func.func @_fused_kernel(%arg0: memref<16x128xf32, #tpu.memory_space<vmem>>, %arg1: memref<16x128xf32, #tpu.memory_space<vmem>>) attributes {dimension_semantics = [], scalar_prefetch = 0 : i64, scratch_operands = 0 : i64, tpu.core_type = #tpu.core_type<tc>} {
    %c0 = arith.constant 0 : index
    %c0_0 = arith.constant 0 : index
    %0 = vector.load %arg0[%c0, %c0_0] : memref<16x128xf32, #tpu.memory_space<vmem>>, vector<16x128xf32>
    %1 = math.absf %0 : vector<16x128xf32>
    %2 = vector.shape_cast %1 : vector<16x128xf32> to vector<1x16x128xf32>
    %cst = arith.constant dense<0xFF800000> : vector<1xf32>
    %3 = vector.multi_reduction <maximumf>, %2, %cst [1, 2] : vector<1x16x128xf32> to vector<1xf32>
    %4 = vector.shape_cast %3 : vector<1xf32> to vector<1x1x1xf32>
    %5 = vector.extract %4[0, 0, 0] : f32 from vector<1x1x1xf32>
    %6 = math.tanh %5 : f32
    %cst_1 = arith.constant 7.500000e+00 : f32
    %7 = arith.divf %cst_1, %6 : f32
    %8 = math.tanh %0 : vector<16x128xf32>
    %9 = vector.broadcast %7 : f32 to vector<16x128xf32>
    %10 = arith.mulf %8, %9 : vector<16x128xf32>
    %cst_2 = arith.constant 7.500000e+00 : f32
    %11 = vector.broadcast %cst_2 : f32 to vector<16x128xf32>
    %12 = arith.addf %10, %11 : vector<16x128xf32>
    %13 = math.roundeven %12 : vector<16x128xf32>
    %cst_3 = arith.constant 0.13333334 : f32
    %14 = vector.broadcast %cst_3 : f32 to vector<16x128xf32>
    %15 = arith.mulf %13, %14 : vector<16x128xf32>
    %cst_4 = arith.constant 1.000000e+00 : f32
    %16 = vector.broadcast %cst_4 : f32 to vector<16x128xf32>
    %17 = arith.subf %15, %16 : vector<16x128xf32>
    %c0_5 = arith.constant 0 : index
    %c0_6 = arith.constant 0 : index
    %18 = vector.load %arg1[%c0_5, %c0_6] : memref<16x128xf32, #tpu.memory_space<vmem>>, vector<16x128xf32>
    tpu.vector_store %arg1[%c0_5, %c0_6], %17 {strides = array<i32>} : memref<16x128xf32, #tpu.memory_space<vmem>>, vector<16x128xf32>,
    return
  }
}

</mosaic_0001>

<bundles_post_ra>
// kernel: tpu_custom_call.1
= control target key start
LH: loop header
LB: loop body
LE: loop exit
PB: predicated region body
PF: predicated region fallthrough
CT: control target
= control target key end

     0   :  { %6 = vsyncpa [#allocation3], 0  ;;  %s182_s0 = inlined_call_operand.hbm [shape: f32[16,128], index: 0, kind: input, shape index: {}]   ;;  %s183_s1 = inlined_call_operand.hbm [shape: f32[16,128], index: 1, kind: output, shape index: {}]  }
   0x1   :  { %7 = vsyncpa [#allocation4], 0  ;;  %s156_s6 = smov [#allocation2]  }
   0x2   :  { %s13_s7 = sshll.u32 %s156_s6, 4  ;;  %s14_s7 = int_to_ptr.vmem [resolvable:$true] %s13_s7 }
   0x3   :  { %s120_s8 = scalar_lea.vmem %s14_s7, 256  ;;  %p125_p1 = scmp.lt.s32.totalorder %s14_s7, %s14_s7 }
   0x4   :  { %p121_p0 = scmp.ne.s32.totalorder %s14_s7, %s120_s8  ;;  %p126_p2 = scmp.lt.s32.totalorder %s120_s8, %s120_s8 }
   0x6   :  { %p127_p3 = por %p126_p2, %p125_p1 }
   0x8   :  { %p128_p4 = pnand %p127_p3, %p121_p0 }
   0xa   :  { %131 = shalt.err (!%p128_p4)
}
   0xb   :  { %s157_s9 = smov 128   ;;  %s158_s10 = smov 8  }
   0xc   :  { %19 = dma.hbm_to_vmem [thread:$0]  %s182_s0, 256, %s14_s7, [#allocation3], %s157_s9, %s157_s9, %s158_s10  }
   0xd   :  { %152 = dma.done.wait [#allocation3], 256  }
   0xe   :  { %153 = vsyncadd [#allocation3], 4294967040  ;;  %v23_v0 = vld [vmem:[#allocation2] sm:$0xff]  ;;  %v24_v1 = vld [vmem:[#allocation2 + $0x8] sm:$0xff]  ;;  %s159_s16 = smov [#allocation5]  }
   0xf   :  { %v25_v2 = vand.u32 2147483647, %v23_v0  ;;  %v26_v3 = vand.u32 2147483647, %v24_v1  ;;  %s64_s17 = sshll.u32 %s159_s16, 4  ;;  %s65_s17 = int_to_ptr.vmem [resolvable:$true] %s64_s17 }
  0x10   :  { %s132_s18 = scalar_lea.vmem %s65_s17, 256  ;;  %p137_p6 = scmp.lt.s32.totalorder %s65_s17, %s65_s17 }
  0x11   :  { %v27_v4 = vmax.f32.f32 %v25_v2, %v26_v3  ;;  %p133_p5 = scmp.ne.s32.totalorder %s65_s17, %s132_s18  ;;  %p138_p7 = scmp.lt.s32.totalorder %s132_s18, %s132_s18 }
  0x13   :  { %28 = vmax.xlane.f32.xlu0 %v27_v4  ;;  %p139_p8 = por %p138_p7, %p137_p6 }
  0x15   :  { %p140_p9 = pnand %p139_p8, %p133_p5 }
  0x9c   :  { %v29_v5 = vpop.xlane.xlu0 %28 }
  0x9d   :  { %v30_v6 = vrot.slane %v29_v5, 4 }
  0x9f   :  { %v31_v7 = vmax.f32 %v29_v5, %v30_v6 }
  0xa1   :  { %v32_v8 = vrot.slane %v31_v7, 2 }
  0xa3   :  { %v33_v9 = vmax.f32 %v31_v7, %v32_v8 }
  0xa5   :  { %v34_v10 = vrot.slane %v33_v9, 1 }
  0xa7   :  { %v35_v11 = vmax.f32 %v33_v9, %v34_v10 }
  0xa9   :  { %78 = vpush %v35_v11 }
  0xda   :  { %s79_s13 = spop %78 }
  0xdb   :  { %v37_v12 = vstv %s79_s13 }
  0xdc   :  { %104 = vtanh.f32 %v37_v12 }
  0xe9   :  { %v105_v13 = vpop.eup %104 }
  0xea   :  { %80 = vpush %v105_v13 }
 0x11b   :  { %s81_s0 = spop %80 }
 0x11c   :  { %v40_v14 = vstv %s81_s0 }
 0x11d   :  { %106 = vrcp.f32 %v40_v14 }
 0x11e   :  { %108 = vtanh.f32 %v23_v0 }
 0x11f   :  { %110 = vtanh.f32 %v24_v1 }
 0x12a   :  { %v107_v15 = vpop.eup %106 }
 0x12b   :  { %82 = vpush %v107_v15  ;;  %v109_v16 = vpop.eup %108 }
 0x12c   :  { %v111_v17 = vpop.eup %110 }
 0x15c   :  { %s83_s14 = spop %82 }
 0x15d   :  { %s43_s15 = smul.f32 7.5, %s83_s14 }
 0x15f   :  { %v46_v18 = vstv %s43_s15 }
 0x160   :  { %v47_v19 = vmul.f32 %v109_v16, %v46_v18  ;;  %v48_v20 = vmul.f32 %v111_v17, %v46_v18 }
 0x162   :  { %v49_v21 = vadd.f32 7.5, %v47_v19  ;;  %v50_v22 = vadd.f32 7.5, %v48_v20 }
 0x164   :  { %v86_v23 = vcvt.f32.s32 %v49_v21  ;;  %v94_v24 = vcvt.f32.s32 %v50_v22  ;;  %v84_v27 = vand.u32 2147483647, %v49_v21  ;;  %v92_v28 = vand.u32 2147483647, %v50_v22 }
 0x165   :  { %v89_v30 = vand.u32 2147483648, %v49_v21  ;;  %v97_v32 = vand.u32 2147483648, %v50_v22 }
 0x166   :  { %v87_v25 = vcvt.s32.f32 %v86_v23  ;;  %v95_v26 = vcvt.s32.f32 %v94_v24  ;;  %vm85_vm0 = vcmp.lt.f32.partialorder %v84_v27, 8388608.0  ;;  %vm93_vm1 = vcmp.lt.f32.partialorder %v92_v28, 8388608.0 }
 0x168   :  { %v88_v29 = vand.u32 2147483647, %v87_v25  ;;  %v96_v31 = vand.u32 2147483647, %v95_v26 }
 0x16a   :  { %v90_v33 = vor.u32 %v89_v30, %v88_v29  ;;  %v98_v34 = vor.u32 %v97_v32, %v96_v31 }
 0x16c   :  { %v91_v35 = vsel %vm85_vm0, %v90_v33, %v49_v21  ;;  %v99_v36 = vsel %vm93_vm1, %v98_v34, %v50_v22 }
 0x16d   :  { %v53_v37 = vmul.f32 0.13333334, %v91_v35  ;;  %v54_v38 = vmul.f32 0.13333334, %v99_v36 }
 0x16f   :  { %v76_v39 = vadd.f32 -1.0, %v53_v37  ;;  %v77_v40 = vadd.f32 -1.0, %v54_v38 }
 0x171   :  { %57 = vst [vmem:[#allocation5] sm:$0xff] %v76_v39  ;;  %58 = vst [vmem:[#allocation5 + $0x8] sm:$0xff] %v77_v40 }
 0x172   :  { %143 = shalt.err (!%p140_p9)
}
 0x173   :  { %70 = dma.vmem_to_hbm [thread:$0]  %s65_s17, 256, %s183_s1, [#allocation4], %s157_s9, %s157_s9, %s158_s10  }
 0x174   :  { %154 = dma.done.wait [#allocation4], 256  }
 0x175   :  { %155 = vsyncadd [#allocation4], 4294967040 }
 0x176   :  { %74 = vsyncpa [#allocation3], 1 }
 0x177   :  { %75 = vsyncpa [#allocation4], 1 }

</bundles_post_ra>
